<compile_context>
chip_gen: v6e
topology: v6e:2x2x1
jax: 0.10.0
libtpu: 0.0.40
codegen_flags: <defaults>
</compile_context>

<pallas_src>
import math

import jax
import jax.numpy as jnp
from jax.experimental import pallas as pl
from jax.experimental.pallas import tpu as pltpu

LEAKY_SLOPE = 0.01   # nn.LeakyReLU default
BN_EPS = 1e-5        # nn.BatchNorm default


# -----------------------------------------------------------------------------
# Kernel 1: shared 1x1-conv MLP + fused max-pool over the point dimension.
#   grid = (B_pad // Bt, Cg, N // Nt); pooled (Bt, Cn) block resident across point axis.
# -----------------------------------------------------------------------------
def conv_pool_kernel(x_ref, w1, w2, b2, w3, b3, pooled_ref):
    Bt, Nt, Cp = x_ref.shape
    j = pl.program_id(2)

    @pl.when(j == 0)
    def _init():
        # running max of *raw* conv3 output -> must start at -inf (bias/relu applied later)
        pooled_ref[...] = jnp.full(pooled_ref.shape, -jnp.inf, pooled_ref.dtype)

    x = x_ref[...].reshape(Bt * Nt, Cp)                       # bf16; pad ch carries 1.0
    # conv1: bias folded into the ones pad channel of w1 -> no bias add.
    h = jnp.maximum(jnp.dot(x, w1[...], preferred_element_type=jnp.float32), 0.0)
    # conv2
    h = jnp.dot(h.astype(jnp.bfloat16), w2[...], preferred_element_type=jnp.float32)
    h = jnp.maximum(h + b2[...], 0.0)
    # conv3: raw matmul only; bias+relu hoisted past the max (they commute with it).
    y3 = jnp.dot(h.astype(jnp.bfloat16), w3[...], preferred_element_type=jnp.float32)

    Cn = y3.shape[-1]
    tile_max = jnp.max(y3.reshape(Bt, Nt, Cn), axis=1)        # vectorized point-dim max
    pooled_ref[...] = jnp.maximum(pooled_ref[...], tile_max)  # one full-block store

    @pl.when(j == pl.num_programs(2) - 1)
    def _finalize():
        pooled_ref[...] = jnp.maximum(pooled_ref[...] + b3[...], 0.0)


# -----------------------------------------------------------------------------
# Kernel 2: FC head (bf16 MXU matmuls, f32 accumulation), batch-tiled.
# -----------------------------------------------------------------------------
def fc_head_kernel(p_ref, fw1, fb1, fw2, fb2, fw3, fb3, out_ref):
    def fc_leaky(h_bf16, w_ref, b_ref):
        y = jnp.dot(h_bf16, w_ref[...], preferred_element_type=jnp.float32) + b_ref[...]
        return jnp.where(y > 0.0, y, LEAKY_SLOPE * y)

    h = fc_leaky(p_ref[...].astype(jnp.bfloat16), fw1, fb1)            # (Bt, 512)
    h = fc_leaky(h.astype(jnp.bfloat16), fw2, fb2)                     # (Bt, 256)
    o = jnp.dot(h.astype(jnp.bfloat16), fw3[...],
                preferred_element_type=jnp.float32) + fb3[...]         # iden folded in
    out_ref[...] = o.astype(out_ref.dtype)


# -----------------------------------------------------------------------------
# Parameter construction (PyTorch default init) and offline BN/identity folding.
# -----------------------------------------------------------------------------
def _init_linear(key, fan_in, fan_out):
    kw, kb = jax.random.split(key)
    bound = 1.0 / math.sqrt(fan_in)
    w = jax.random.uniform(kw, (fan_out, fan_in), jnp.float32, -bound, bound)
    b = jax.random.uniform(kb, (fan_out,), jnp.float32, -bound, bound)
    return w, b


def _bn_default(num_ch):
    # (gamma, beta, running_mean, running_var) — PyTorch defaults.
    return (jnp.ones((num_ch,), jnp.float32), jnp.zeros((num_ch,), jnp.float32),
            jnp.zeros((num_ch,), jnp.float32), jnp.ones((num_ch,), jnp.float32))


def make_raw_params(key, in_ch, K):
    keys = jax.random.split(key, 6)
    dims = [("conv1", in_ch, 64), ("conv2", 64, 128), ("conv3", 128, 1024),
            ("fc1", 1024, 512), ("fc2", 512, 256)]
    raw = {}
    for k, (name, ci, co) in zip(keys[:5], dims):
        w, b = _init_linear(k, ci, co)
        raw[name] = dict(w=w, b=b, bn=_bn_default(co))
    w3, b3 = _init_linear(keys[5], 256, K * K)
    raw["fc3"] = dict(w=w3, b=b3)
    return raw


def _fold_bn(w, b, bn):
    gamma, beta, mean, var = bn
    scale = gamma / jnp.sqrt(var + BN_EPS)
    shift = beta - mean * scale
    return w * scale[:, None], b * scale + shift


def fold_for_kernel(raw, in_ch, K, cin_pad):
    """BN folded into weights; conv1 bias folded into ones pad channel; identity into fc3."""
    p = {}
    # conv1: (in_ch -> 64), bias placed in row `in_ch` of the padded weight.
    w, b = _fold_bn(raw["conv1"]["w"], raw["conv1"]["b"], raw["conv1"]["bn"])
    w1 = jnp.zeros((cin_pad, w.shape[0]), jnp.float32)
    w1 = w1.at[:in_ch, :].set(w.T)
    w1 = w1.at[in_ch, :].set(b)                               # x pad channel == 1.0
    p["conv1"] = (w1.astype(jnp.bfloat16),)
    # conv2
    w, b = _fold_bn(raw["conv2"]["w"], raw["conv2"]["b"], raw["conv2"]["bn"])
    p["conv2"] = (w.T.astype(jnp.bfloat16), b[None, :].astype(jnp.float32))
    # conv3: bias applied in the post-max epilogue.
    w, b = _fold_bn(raw["conv3"]["w"], raw["conv3"]["b"], raw["conv3"]["bn"])
    p["conv3"] = (w.T.astype(jnp.bfloat16), b[None, :].astype(jnp.float32))
    # fc1/fc2 (bf16 weights, f32 bias).
    for name in ("fc1", "fc2"):
        w, b = _fold_bn(raw[name]["w"], raw[name]["b"], raw[name]["bn"])
        p[name] = (w.T.astype(jnp.bfloat16), b[None, :].astype(jnp.float32))
    w3, b3 = raw["fc3"]["w"], raw["fc3"]["b"]
    fb3 = b3[None, :] + jnp.eye(K, dtype=jnp.float32).reshape(1, K * K)
    p["fc3"] = (w3.T.astype(jnp.bfloat16), fb3)
    return p


# -----------------------------------------------------------------------------
# Tile selection.
# -----------------------------------------------------------------------------
_ROW_BUDGET = 1024   # Bt*Nt cap -> conv3 f32 slab ~4 MiB, fits all generations' VMEM


def _pick_batch(B):
    """Returns (B_pad, Bt): full batch if small, else pad to a multiple of 8 and tile by 8."""
    if B <= 8:
        return B, B
    B_pad = ((B + 7) // 8) * 8
    return B_pad, 8


def _pick_point_tile(N, cap):
    if N <= cap:
        return N
    nt = max(8, (cap // 8) * 8)
    while nt >= 8:
        if N % nt == 0:
            return nt
        nt -= 8
    return N


def _pick_fc_batch_tile(B_pad, cap=256):
    if B_pad <= cap:
        return B_pad
    bt = (cap // 8) * 8
    while bt >= 8:
        if B_pad % bt == 0:
            return bt
        bt -= 8
    return B_pad


# -----------------------------------------------------------------------------
# Wrapper
# -----------------------------------------------------------------------------
def transform_net_forward(x_nchw, raw_params, K):
    """x_nchw: (B, in_ch, N, 1) float32 -> (B, K, K) float32."""
    B, Cin, N, W = x_nchw.shape
    assert W == 1, "expects width-1 input (point-cloud convention)"
    KK = K * K
    Cp = ((Cin + 1 + 7) // 8) * 8            # pad contraction dim; +1 for the ones channel
    p = fold_for_kernel(raw_params, Cin, K, Cp)

    # layout glue: NCHW (B, Cin, N, 1) -> channels-last (B, N, Cp) bf16, ones channel at Cin.
    x_bnc = jnp.transpose(x_nchw[..., 0], (0, 2, 1)).astype(jnp.bfloat16)
    parts = [x_bnc, jnp.ones((B, N, 1), jnp.bfloat16)]
    if Cp - Cin - 1 > 0:
        parts.append(jnp.zeros((B, N, Cp - Cin - 1), jnp.bfloat16))
    x_bnc = jnp.concatenate(parts, axis=-1)

    B_pad, Bt = _pick_batch(B)
    if B_pad != B:
        x_bnc = jnp.pad(x_bnc, ((0, B_pad - B), (0, 0), (0, 0)))
    Bg = B_pad // Bt

    Nt = _pick_point_tile(N, cap=max(8, _ROW_BUDGET // Bt))
    Ng = N // Nt
    # Second parallel axis over conv3 output channels when only one batch block exists,
    # so both v7x TensorCores have work (conv1/2 recomputed per half; conv3 dominates).
    Cg = 2 if Bg == 1 else 1
    Cn = 1024 // Cg

    conv_args = (x_bnc, p["conv1"][0], *p["conv2"], *p["conv3"])

    pooled = pl.pallas_call(
        conv_pool_kernel,
        out_shape=jax.ShapeDtypeStruct((B_pad, 1024), jnp.float32),
        grid_spec=pltpu.PrefetchScalarGridSpec(
            num_scalar_prefetch=0,
            grid=(Bg, Cg, Ng),
            in_specs=[
                pl.BlockSpec((Bt, Nt, Cp), lambda i, c, j: (i, j, 0)),   # x
                pl.BlockSpec((Cp, 64), lambda i, c, j: (0, 0)),          # w1 (bias folded)
                pl.BlockSpec((64, 128), lambda i, c, j: (0, 0)),         # w2
                pl.BlockSpec((1, 128), lambda i, c, j: (0, 0)),          # b2
                pl.BlockSpec((128, Cn), lambda i, c, j: (0, c)),         # w3 (channel split)
                pl.BlockSpec((1, Cn), lambda i, c, j: (0, c)),           # b3 (epilogue)
            ],
            out_specs=pl.BlockSpec((Bt, Cn), lambda i, c, j: (i, c)),
        ),
        compiler_params=pltpu.CompilerParams(
            dimension_semantics=("parallel", "parallel", "arbitrary"),
            vmem_limit_bytes=32 << 20,
        ),
    )(*conv_args)

    # ---- FC head ----
    Bt_fc = _pick_fc_batch_tile(B_pad)
    fc_args = (pooled, *p["fc1"], *p["fc2"], *p["fc3"])

    out = pl.pallas_call(
        fc_head_kernel,
        out_shape=jax.ShapeDtypeStruct((B_pad, KK), jnp.float32),
        grid_spec=pltpu.PrefetchScalarGridSpec(
            num_scalar_prefetch=0,
            grid=(B_pad // Bt_fc,),
            in_specs=[
                pl.BlockSpec((Bt_fc, 1024), lambda i: (i, 0)),
                pl.BlockSpec((1024, 512), lambda i: (0, 0)),
                pl.BlockSpec((1, 512), lambda i: (0, 0)),
                pl.BlockSpec((512, 256), lambda i: (0, 0)),
                pl.BlockSpec((1, 256), lambda i: (0, 0)),
                pl.BlockSpec((256, KK), lambda i: (0, 0)),
                pl.BlockSpec((1, KK), lambda i: (0, 0)),
            ],
            out_specs=pl.BlockSpec((Bt_fc, KK), lambda i: (i, 0)),
        ),
        compiler_params=pltpu.CompilerParams(
            dimension_semantics=("parallel",),
        ),
    )(*fc_args)

    return out[:B].reshape(B, K, K)


# -----------------------------------------------------------------------------
# Pure-JAX f32 reference (explicit, unfolded BN) for a correctness sanity check.
# -----------------------------------------------------------------------------
def transform_net_reference(x_nchw, raw, K):
    x = jnp.transpose(x_nchw[..., 0], (0, 2, 1))              # (B, N, Cin)

    def bn(y, s):
        gamma, beta, mean, var = s
        return (y - mean) * gamma / jnp.sqrt(var + BN_EPS) + beta

    def cbr(h, layer):
        y = bn(h @ layer["w"].T + layer["b"], layer["bn"])
        return jnp.maximum(y, 0.0)

    def fbl(h, layer):
        y = bn(h @ layer["w"].T + layer["b"], layer["bn"])
        return jnp.where(y > 0.0, y, LEAKY_SLOPE * y)

    h = cbr(x, raw["conv1"])
    h = cbr(h, raw["conv2"])
    h = cbr(h, raw["conv3"])
    v = jnp.max(h, axis=1)                                    # (B, 1024)
    f = fbl(v, raw["fc1"])
    f = fbl(f, raw["fc2"])
    o = f @ raw["fc3"]["w"].T + raw["fc3"]["b"] + jnp.eye(K).reshape(1, K * K)
    return o.reshape(x.shape[0], K, K)


if __name__ == "__main__":
    B, IN_CH, N, K = 2, 3, 64, 3

    key = jax.random.PRNGKey(0)
    k_x, k_p = jax.random.split(key)
    x = jax.random.normal(k_x, (B, IN_CH, N, 1), dtype=jnp.float32)   # NCHW
    raw = make_raw_params(k_p, IN_CH, K)

    out = transform_net_forward(x, raw, K)
    out = jax.block_until_ready(out)

    ref = transform_net_reference(x, raw, K)
    assert out.shape == (B, K, K)
    # bf16 conv + bf16 FC MXU matmuls (f32 accumulate) -> loosened tolerance vs f32 ref.
    assert jnp.allclose(out, ref, atol=6e-2, rtol=6e-2), "mismatch vs JAX reference"

    print("KERNEL_OK")
</pallas_src>

<mosaic_0001>
module attributes {stable_mosaic.version = 11 : i64} {
  func.func @conv_pool_kernel(%arg0: i32, %arg1: i32, %arg2: i32, %arg3: memref<2x64x8xbf16, #tpu.memory_space<vmem>>, %arg4: memref<8x64xbf16, #tpu.memory_space<vmem>>, %arg5: memref<64x128xbf16, #tpu.memory_space<vmem>>, %arg6: memref<1x128xf32, #tpu.memory_space<vmem>>, %arg7: memref<128x512xbf16, #tpu.memory_space<vmem>>, %arg8: memref<1x512xf32, #tpu.memory_space<vmem>>, %arg9: memref<2x512xf32, #tpu.memory_space<vmem>>) attributes {dimension_semantics = [#tpu.dimension_semantics<parallel>, #tpu.dimension_semantics<parallel>, #tpu.dimension_semantics<arbitrary>], iteration_bounds = array<i64: 1, 2, 1>, scalar_prefetch = 0 : i64, scratch_operands = 0 : i64, tpu.core_type = #tpu.core_type<tc>, window_params = [{transform_indices = @transform_0, window_bounds = array<i64: 2, 64, 8>}, {pipeline_mode = #tpu.pipeline_mode<synchronous>, transform_indices = @transform_1, window_bounds = array<i64: 8, 64>}, {pipeline_mode = #tpu.pipeline_mode<synchronous>, transform_indices = @transform_2, window_bounds = array<i64: 64, 128>}, {pipeline_mode = #tpu.pipeline_mode<synchronous>, transform_indices = @transform_3, window_bounds = array<i64: 1, 128>}, {transform_indices = @transform_4, window_bounds = array<i64: 128, 512>}, {transform_indices = @transform_5, window_bounds = array<i64: 1, 512>}, {transform_indices = @transform_6, window_bounds = array<i64: 2, 512>}]} {
    %c0_i32 = arith.constant 0 : i32
    %0 = arith.cmpi eq, %arg2, %c0_i32 : i32
    %1 = arith.extui %0 : i1 to i32
    %c0_i32_0 = arith.constant 0 : i32
    %2 = arith.cmpi ne, %1, %c0_i32_0 : i32
    scf.if %2 {
      %cst_22 = arith.constant 0xFF800000 : f32
      %28 = vector.broadcast %cst_22 : f32 to vector<2x512xf32>
      %c0_23 = arith.constant 0 : index
      %c0_24 = arith.constant 0 : index
      %29 = vector.load %arg9[%c0_23, %c0_24] : memref<2x512xf32, #tpu.memory_space<vmem>>, vector<2x512xf32>
      tpu.vector_store %arg9[%c0_23, %c0_24], %28 {strides = array<i32>} : memref<2x512xf32, #tpu.memory_space<vmem>>, vector<2x512xf32>,
    } else {
    }
    %c0 = arith.constant 0 : index
    %c0_1 = arith.constant 0 : index
    %c0_2 = arith.constant 0 : index
    %3 = vector.load %arg3[%c0, %c0_1, %c0_2] : memref<2x64x8xbf16, #tpu.memory_space<vmem>>, vector<2x64x8xbf16>
    %4 = vector.shape_cast %3 : vector<2x64x8xbf16> to vector<128x8xbf16>
    %c0_3 = arith.constant 0 : index
    %c0_4 = arith.constant 0 : index
    %5 = vector.load %arg4[%c0_3, %c0_4] : memref<8x64xbf16, #tpu.memory_space<vmem>>, vector<8x64xbf16>
    %cst = arith.constant dense<0.000000e+00> : vector<128x64xf32>
    %6 = tpu.matmul %4, %5, %cst {dimension_numbers = #tpu.dot_dimension_numbers<[1], [0], [0], [1], [0, 0, 1, 1], [], []>} : vector<128x8xbf16>, vector<8x64xbf16>, vector<128x64xf32> -> vector<128x64xf32>
    %cst_5 = arith.constant 0.000000e+00 : f32
    %7 = vector.broadcast %cst_5 : f32 to vector<128x64xf32>
    %8 = arith.maximumf %6, %7 : vector<128x64xf32>
    %9 = arith.truncf %8 : vector<128x64xf32> to vector<128x64xbf16>
    %c0_6 = arith.constant 0 : index
    %c0_7 = arith.constant 0 : index
    %10 = vector.load %arg5[%c0_6, %c0_7] : memref<64x128xbf16, #tpu.memory_space<vmem>>, vector<64x128xbf16>
    %cst_8 = arith.constant dense<0.000000e+00> : vector<128x128xf32>
    %11 = tpu.matmul %9, %10, %cst_8 {dimension_numbers = #tpu.dot_dimension_numbers<[1], [0], [0], [1], [0, 0, 1, 1], [], []>} : vector<128x64xbf16>, vector<64x128xbf16>, vector<128x128xf32> -> vector<128x128xf32>
    %c0_9 = arith.constant 0 : index
    %c0_10 = arith.constant 0 : index
    %12 = vector.load %arg6[%c0_9, %c0_10] : memref<1x128xf32, #tpu.memory_space<vmem>>, vector<1x128xf32>
    %13 = vector.broadcast %12 : vector<1x128xf32> to vector<128x128xf32>
    %14 = arith.addf %11, %13 : vector<128x128xf32>
    %cst_11 = arith.constant 0.000000e+00 : f32
    %15 = vector.broadcast %cst_11 : f32 to vector<128x128xf32>
    %16 = arith.maximumf %14, %15 : vector<128x128xf32>
    %17 = arith.truncf %16 : vector<128x128xf32> to vector<128x128xbf16>
    %c0_12 = arith.constant 0 : index
    %c0_13 = arith.constant 0 : index
    %18 = vector.load %arg7[%c0_12, %c0_13] : memref<128x512xbf16, #tpu.memory_space<vmem>>, vector<128x512xbf16>
    %cst_14 = arith.constant dense<0.000000e+00> : vector<128x512xf32>
    %19 = tpu.matmul %17, %18, %cst_14 {dimension_numbers = #tpu.dot_dimension_numbers<[1], [0], [0], [1], [0, 0, 1, 1], [], []>} : vector<128x128xbf16>, vector<128x512xbf16>, vector<128x512xf32> -> vector<128x512xf32>
    %20 = vector.shape_cast %19 : vector<128x512xf32> to vector<2x64x512xf32>
    %cst_15 = arith.constant dense<0xFF800000> : vector<2x512xf32>
    %21 = vector.multi_reduction <maximumf>, %20, %cst_15 [1] : vector<2x64x512xf32> to vector<2x512xf32>
    %c0_16 = arith.constant 0 : index
    %c0_17 = arith.constant 0 : index
    %22 = vector.load %arg9[%c0_16, %c0_17] : memref<2x512xf32, #tpu.memory_space<vmem>>, vector<2x512xf32>
    %23 = arith.maximumf %22, %21 : vector<2x512xf32>
    %c0_18 = arith.constant 0 : index
    %c0_19 = arith.constant 0 : index
    %24 = vector.load %arg9[%c0_18, %c0_19] : memref<2x512xf32, #tpu.memory_space<vmem>>, vector<2x512xf32>
    tpu.vector_store %arg9[%c0_18, %c0_19], %23 {strides = array<i32>} : memref<2x512xf32, #tpu.memory_space<vmem>>, vector<2x512xf32>,
    %c0_i32_20 = arith.constant 0 : i32
    %25 = arith.cmpi eq, %arg2, %c0_i32_20 : i32
    %26 = arith.extui %25 : i1 to i32
    %c0_i32_21 = arith.constant 0 : i32
    %27 = arith.cmpi ne, %26, %c0_i32_21 : i32
    scf.if %27 {
      %c0_22 = arith.constant 0 : index
      %c0_23 = arith.constant 0 : index
      %28 = vector.load %arg9[%c0_22, %c0_23] : memref<2x512xf32, #tpu.memory_space<vmem>>, vector<2x512xf32>
      %c0_24 = arith.constant 0 : index
      %c0_25 = arith.constant 0 : index
      %29 = vector.load %arg8[%c0_24, %c0_25] : memref<1x512xf32, #tpu.memory_space<vmem>>, vector<1x512xf32>
      %30 = vector.broadcast %29 : vector<1x512xf32> to vector<2x512xf32>
      %31 = arith.addf %28, %30 : vector<2x512xf32>
      %cst_26 = arith.constant 0.000000e+00 : f32
      %32 = vector.broadcast %cst_26 : f32 to vector<2x512xf32>
      %33 = arith.maximumf %31, %32 : vector<2x512xf32>
      %c0_27 = arith.constant 0 : index
      %c0_28 = arith.constant 0 : index
      %34 = vector.load %arg9[%c0_27, %c0_28] : memref<2x512xf32, #tpu.memory_space<vmem>>, vector<2x512xf32>
      tpu.vector_store %arg9[%c0_27, %c0_28], %33 {strides = array<i32>} : memref<2x512xf32, #tpu.memory_space<vmem>>, vector<2x512xf32>,
    } else {
    }
    return
  }
  func.func @transform_0(%arg0: i32, %arg1: i32, %arg2: i32) -> (i32, i32, i32) {
    %c0_i32 = arith.constant 0 : i32
    %c0_i32_0 = arith.constant 0 : i32
    return %arg0, %arg2, %c0_i32 : i32, i32, i32
  }
  func.func @transform_1(%arg0: i32, %arg1: i32, %arg2: i32) -> (i32, i32) {
    %c0_i32 = arith.constant 0 : i32
    %c0_i32_0 = arith.constant 0 : i32
    %c0_i32_1 = arith.constant 0 : i32
    return %c0_i32, %c0_i32_0 : i32, i32
  }
  func.func @transform_2(%arg0: i32, %arg1: i32, %arg2: i32) -> (i32, i32) {
    %c0_i32 = arith.constant 0 : i32
    %c0_i32_0 = arith.constant 0 : i32
    %c0_i32_1 = arith.constant 0 : i32
    return %c0_i32, %c0_i32_0 : i32, i32
  }
  func.func @transform_3(%arg0: i32, %arg1: i32, %arg2: i32) -> (i32, i32) {
    %c0_i32 = arith.constant 0 : i32
    %c0_i32_0 = arith.constant 0 : i32
    %c0_i32_1 = arith.constant 0 : i32
    return %c0_i32, %c0_i32_0 : i32, i32
  }
  func.func @transform_4(%arg0: i32, %arg1: i32, %arg2: i32) -> (i32, i32) {
    %c0_i32 = arith.constant 0 : i32
    %c0_i32_0 = arith.constant 0 : i32
    return %c0_i32, %arg1 : i32, i32
  }
  func.func @transform_5(%arg0: i32, %arg1: i32, %arg2: i32) -> (i32, i32) {
    %c0_i32 = arith.constant 0 : i32
    %c0_i32_0 = arith.constant 0 : i32
    return %c0_i32, %arg1 : i32, i32
  }
  func.func @transform_6(%arg0: i32, %arg1: i32, %arg2: i32) -> (i32, i32) {
    %c0_i32 = arith.constant 0 : i32
    return %arg0, %arg1 : i32, i32
  }
}

</mosaic_0001>

<bundles_post_ra>
// kernel: tpu_custom_call.1
= control target key start
LH: loop header
LB: loop body
LE: loop exit
PB: predicated region body
PF: predicated region fallthrough
CT: control target
= control target key end

     0   :  { %11 = vsyncpa [#allocation3], 0  ;;  %s2201_s0 = inlined_call_operand.vmem [shape: bf16[2,64,8], index: 0, kind: input, shape index: {}]   ;;  %s2202_s1 = inlined_call_operand.vmem [shape: bf16[8,64], index: 1, kind: input, shape index: {}]   ;;  %s2203_s2 = inlined_call_operand.vmem [shape: bf16[64,128], index: 2, kind: input, shape index: {}]   ;;  %s2204_s3 = inlined_call_operand.vmem [shape: f32[1,128], index: 3, kind: input, shape index: {}]   ;;  %s2205_s4 = inlined_call_operand.hbm [shape: bf16[128,1024], index: 4, kind: input, shape index: {}]   ;;  %s2206_s5 = inlined_call_operand.vmem [shape: f32[1,1024], index: 5, kind: input, shape index: {}]   ;;  %s2207_s6 = inlined_call_operand.hbm [shape: f32[2,1024], index: 6, kind: output, shape index: {}]  }
   0x1   :  { %13 = vsyncpa [#allocation3 + $0x1], 0 }
   0x2   :  { %14 = vsyncpa [#allocation4], 0 }
   0x3   :  { %16 = vsyncpa [#allocation4 + $0x1], 0  ;;  %s1930_s21 = smov 0   ;;  %s1932_s22 = smov 0  }
   0x4   :  { %s1934_s23 = smov 0   ;;  %s1936_s24 = smov 0  }
   0x5   :  { %s1938_s25 = smov 0   ;;  %s1940_s26 = smov 0  }
   0x6 LB: > { %s1506_s27 = sadd.s32 4294967295, %s1886_s26   ;;  %s1507_s28 = sadd.s32 4294967294, %s1886_s26   ;;  %s1886_s26 = sphi %s1940_s26, %s22_s26   ;;  %s1882_s25 = sphi %s1938_s25, %s2222_s25   ;;  %s1878_s24 = sphi %s1936_s24, %s2221_s24   ;;  %s1874_s23 = sphi %s1934_s23, %s2220_s23   ;;  %s1870_s22 = sphi %s1932_s22, %s2219_s22   ;;  %s1866_s21 = sphi %s1930_s21, %s2218_s21  }
   0x7   : > { %s37_s29 = sadd.s32 1, %s1882_s25  ;;  %s139_s30 = sadd.s32 1, %s1874_s23 }
   0x8   : > { %p39_p0 = scmp.ge.s32.totalorder %s37_s29, 2  ;;  %p146_p1 = scmp.ne.s32.totalorder %s1874_s23, %s1870_s22 }
   0x9   : > { %p147_p2 = scmp.eq.s32.totalorder %s1886_s26, 0  ;;  %p152_p3 = scmp.ne.s32.totalorder %s1870_s22, %s1866_s21 }
   0xa   : > { %s2224_s29 = smov (%p39_p0, %s37_s29), 0  ;;  %p153_p5 = scmp.eq.s32.totalorder %s1506_s27, 0 }
   0xb   : > { %2209 = sst [smem:[#allocation8_spill]] %s2224_s29  ;;  %p1971_p4 = por %p147_p2, %p146_p1 }
   0xc   : > { %s136_s8 = ssub.s32 %s1882_s25, %s2224_s29  ;;  %p204_p6 = scmp.eq.s32.totalorder %s1506_s27, 1 }
   0xd   : > { %p137_p7 = scmp.eq.s32.totalorder %s136_s8, 0  ;;  %p1977_p8 = por %p153_p5, %p152_p3 }
   0xe   : > { %p1981_p9 = por %p204_p6, %p146_p1  ;;  %p210_p10 = scmp.eq.s32.totalorder %s1507_s28, 1 }
   0xf   : > { %s1986_s11 = scalar_select %p137_p7, %s1874_s23, %s139_s30  }
  0x10   : > { %p1988_p11 = por %p210_p10, %p152_p3  ;;  %p1662_p13 = scmp.lt.s32.totalorder %s1886_s26, 2 }
  0x11   : > { %s254_s13 = sand.u32 1, %s1874_s23   ;;  %s1584_s15 = sshll.u32 %s1882_s25, 8 }
  0x12   : > { %s1511_s14 = sshll.u32 %s254_s13, 8  ;;  %s264_s18 = scalar_lea.hbm %s2205_s4, %s1584_s15 }
  0x13   : > { %s258_s19 = scalar_lea.vmem [#allocation2], %s1511_s14  ;;  %p2001_p0 = pnand %p1662_p13, %p1971_p4 }
  0x14   : > { %s265_s20 = sshll.u32 %s258_s19, 4  ;;  %s255_s28 = scalar_lea.sflag [#allocation3], %s254_s13  ;;  %s266_s20 = int_to_ptr.vmem [resolvable:$true] %s265_s20 }
  0x15   : > { %p1780_p1 = pneg %p2001_p0  ;;  %s1791_s30 = scalar_lea.vmem %s266_s20, 4096 }
  0x16   : > { %p1792_p2 = scmp.ne.s32.totalorder %s266_s20, %s1791_s30  ;;  %s1888_s8 = smov [#allocation2]  }
  0x17   : > { %s1796_s29 = sshll.u32 %s1888_s8, 4  ;;  %s1797_s29 = int_to_ptr.vmem [resolvable:$false] %s1796_s29 }
  0x18   : > { %p1794_p3 = pnand %p1792_p2, %p1780_p1  ;;  %s1798_s15 = scalar_lea.vmem %s1797_s29, 8192 }
  0x19   : > { %p1799_p6 = scmp.lt.s32.totalorder %s266_s20, %s1797_s29  ;;  %p1800_p7 = scmp.lt.s32.totalorder %s1798_s15, %s1791_s30 }
  0x1a   : > { %p1795_p5 = pneg %p1794_p3 }
  0x1b   : > { %p1801_p10 = por %p1800_p7, %p1799_p6 }
  0x1d   : > { %p1802_p12 = pnand %p1801_p10, %p1795_p5 }
  0x1f   : > { %1805 = shalt.err (!%p1802_p12)
}
  0x20   : > { %s1889_s7 = smov 512   ;;  %s1890_s13 = smov 256  }
  0x21   : > { %s1891_s14 = smov 16   ;;  %p1514_p4 = scmp.ge.s32.totalorder %s1886_s26, 1 }
  0x22   : > { %1657 = dma.hbm_to_vmem [thread:$0]  (!%p2001_p0), %s264_s18, 4096, %s266_s20, %s255_s28, %s1889_s7, %s1890_s13, %s1891_s14  }
  0x23   : > { %p281_p13 = scmp.lt.s32.totalorder %s1886_s26, 3 }
  0x25   : > { %p282_p1 = pnand %p1514_p4, %p281_p13 }
  0x26   : > { %s2012_s16 = sand.u32 (!%p282_p1), 1, %s1870_s22  }
  0x27   : > { %285 = sbr.rel (%p282_p1) target bundleno = 757 (0x2f5), region = 44  ;;  %s1515_s29 = sshll.u32 (!%p282_p1), %s2012_s16, 8 }
  0x28   : > { %s288_s17 = scalar_lea.sflag (!%p282_p1), [#allocation3], %s2012_s16  ;;  %s2016_s19 = scalar_lea.vmem (!%p282_p1), [#allocation2], %s1515_s29 }
  0x2c   : > { %1857 = dma.done.wait (%p1977_p8), %s288_s17, 4096  }
  0x2d   : > { %1859 = vsyncadd (%p1977_p8), %s288_s17, 4294963200  ;;  %vm441_vm0 = vcmask 1043456   ;;  %vm416_vm1 = vcmask 64512   ;;  %v375_v0 = vld [vmem:[%s2202_s1] sm:$0xf]  ;;  %v1719_v3 = vld [vmem:[%s2201_s0 + $0x8] sm:$0xff]  }
  0x2e   : > { %1649 = vmatprep.subr.msk.bf16.mxu0 %vm441_vm0, %v375_v0  ;;  %v443_v1 = vsel %vm441_vm0, %v375_v0, 0  ;;  %v1718_v2 = vld [vmem:[%s2201_s0] sm:$0xff]   ;;  %v1720_v4 = vld [vmem:[%s2201_s0 + $0x10] sm:$0xff]   ;;  %v1721_v5 = vld [vmem:[%s2201_s0 + $0x18] sm:$0xff]   ;;  %vm605_vm2 = vcmask 523264   ;;  %vm1321_vm3 = vcmask 1041409  }
  0x2f   : > { %1608 = vmatpush3.bf16.msra.mxu0 %v443_v1  ;;  %1609 = vmatprep.mubr.msk.bf16.mxu0 %vm416_vm1, %v1718_v2  ;;  %v1722_v6 = vld [vmem:[%s2201_s0 + $0x20] sm:$0xff]   ;;  %v1726_v7 = vld [vmem:[%s2203_s2 + $0x18] sm:$0xff]   ;;  %v1723_v8 = vld [vmem:[%s2201_s0 + $0x28] sm:$0xff]   ;;  %vm1323_vm4 = vcmask 1043459   ;;  %vm1325_vm5 = vcmask 1045509   ;;  %s1516_s9 = sshll.u32 %s2012_s16, 3 }
  0x30   : > { %1625 = vmatprep.subr.bf16.mxu1 %v1726_v7  ;;  %v1724_v9 = vld [vmem:[%s2201_s0 + $0x30] sm:$0xff]   ;;  %v1725_v10 = vld [vmem:[%s2201_s0 + $0x38] sm:$0xff]   ;;  %v1728_v12 = vld [vmem:[%s2203_s2 + $0x8] sm:$0xff]   ;;  %vm1327_vm6 = vcmask 1047559   ;;  %s1585_s15 = sshll.u32 %s1878_s24, 7  ;;  %s333_s7 = scalar_lea.vmem [#allocation5], %s1516_s9 }
  0x31   : > { %1626 = vmatpush3.bf16.msra.mxu1 %v1726_v7  ;;  %v1727_v11 = vld [vmem:[%s2203_s2 + $0x10] sm:$0xff]   ;;  %v1729_v13 = vld [vmem:[%s2203_s2] sm:$0xff]   ;;  %v1735_v16 = vld [vmem:[%s2016_s19 + $0xec] ss:$16 sps:$4 sm:$0xff]   ;;  %s1392_s13 = sshll.u32 %s333_s7, 4  ;;  %s1390_s17 = scalar_lea.hbm %s2207_s6, %s1585_s15  ;;  %s1393_s13 = int_to_ptr.vmem [resolvable:$true] %s1392_s13 }
  0x32   : > { %1610 = vmatmul.mubr.msk.bf16.vlgmr.msra.gmra.mxu0 %vm416_vm1, %v1719_v3  ;;  %1627 = vmatprep.subr.bf16.mxu1 %v1727_v11  ;;  %v1730_v14 = vld [vmem:[%s2016_s19 + $0xe0] ss:$16 sps:$4 sm:$0xff]   ;;  %v1732_v15 = vld [vmem:[%s2016_s19 + $0xe4] ss:$16 sps:$4 sm:$0xff]   ;;  %v1733_v35 = vld [vmem:[%s2016_s19 + $0xe8] ss:$16 sps:$4 sm:$0xff]  }
  0x33   : > { %1613 = vmatprep.mubr.msk.bf16.mxu0 %vm416_vm1, %v1720_v4  ;;  %v1738_v17 = vld [vmem:[%s2016_s19 + $0xc4] ss:$16 sps:$4 sm:$0xff]   ;;  %943 = vmatprep.subr.bf16.mxu0 %v1732_v15  ;;  %v1736_v18 = vld [vmem:[%s2016_s19 + $0xc0] ss:$16 sps:$4 sm:$0xff]   ;;  %v1741_v38 = vld [vmem:[%s2016_s19 + $0xcc] ss:$16 sps:$4 sm:$0xff]  }
  0x34   : > { %944 = vmatpush1.bf16.msra.mxu0 %v1730_v14  ;;  %v1744_v19 = vld [vmem:[%s2016_s19 + $0xa4] ss:$16 sps:$4 sm:$0xff]   ;;  %v1742_v20 = vld [vmem:[%s2016_s19 + $0xa0] ss:$16 sps:$4 sm:$0xff]   ;;  %v1739_v43 = vld [vmem:[%s2016_s19 + $0xc8] ss:$16 sps:$4 sm:$0xff]  }
  0x35   : > { %1628 = vmatpush3.bf16.msra.mxu1 %v1727_v11  ;;  %945 = vmatprep.subr.bf16.mxu0 %v1738_v17  ;;  %v1750_v21 = vld [vmem:[%s2016_s19 + $0x84] ss:$16 sps:$4 sm:$0xff]   ;;  %v1748_v22 = vld [vmem:[%s2016_s19 + $0x80] ss:$16 sps:$4 sm:$0xff]   ;;  %v1747_v45 = vld [vmem:[%s2016_s19 + $0xac] ss:$16 sps:$4 sm:$0xff]  }
  0x36   : > { %1629 = vmatprep.subr.bf16.mxu1 %v1728_v12  ;;  %v1756_v23 = vld [vmem:[%s2016_s19 + $0x64] ss:$16 sps:$4 sm:$0xff]   ;;  %v1754_v24 = vld [vmem:[%s2016_s19 + $0x60] ss:$16 sps:$4 sm:$0xff]   ;;  %v1745_v50 = vld [vmem:[%s2016_s19 + $0xa8] ss:$16 sps:$4 sm:$0xff]  }
  0x37   : > { %v1753_v52 = vld [vmem:[%s2016_s19 + $0x8c] ss:$16 sps:$4 sm:$0xff]   ;;  %v1751_v57 = vld [vmem:[%s2016_s19 + $0x88] ss:$16 sps:$4 sm:$0xff]   ;;  %v1768_v14 = vld [vmem:[%s2016_s19 + $0x24] ss:$16 sps:$4 sm:$0xff]  }
  0x38   : > { %946 = vmatpush1.bf16.msra.mxu0 %v1736_v18  ;;  %v1759_v59 = vld [vmem:[%s2016_s19 + $0x6c] ss:$16 sps:$4 sm:$0xff]   ;;  %v1757_v0 = vld [vmem:[%s2016_s19 + $0x68] ss:$16 sps:$4 sm:$0xff]   ;;  %v1774_v18 = vld [vmem:[%s2016_s19 + $0x4] ss:$16 sps:$4 sm:$0xff]  }
  0x39   : > { %1630 = vmatpush3.bf16.msra.mxu1 %v1728_v12  ;;  %947 = vmatprep.subr.bf16.mxu0 %v1744_v19  ;;  %v1765_v11 = vld [vmem:[%s2016_s19 + $0x4c] ss:$16 sps:$4 sm:$0xff]   ;;  %v1760_v12 = vld [vmem:[%s2016_s19 + $0x40] ss:$16 sps:$4 sm:$0xff]   ;;  %v1769_v17 = vld [vmem:[%s2016_s19 + $0x28] ss:$16 sps:$4 sm:$0xff]  }
  0x3a   : > { %1614 = vmatmul.mubr.msk.bf16.gmra.mxu0 %vm416_vm1, %v1721_v5  ;;  %1631 = vmatprep.subr.bf16.mxu1 %v1729_v13  ;;  %v1771_v15 = vld [vmem:[%s2016_s19 + $0x2c] ss:$16 sps:$4 sm:$0xff]   ;;  %s1376_s18 = scalar_lea.sflag [#allocation4], %s2012_s16  ;;  %s1806_s20 = scalar_lea.vmem %s1393_s13, 128 }
  0x3b   : > { %1617 = vmatprep.mubr.msk.bf16.mxu0 %vm416_vm1, %v1722_v6  ;;  %v1777_v19 = vld [vmem:[%s2016_s19 + $0xc] ss:$16 sps:$4 sm:$0xff]   ;;  %p1807_p12 = scmp.ne.s32.totalorder %s1393_s13, %s1806_s20 }
  0x3c   : > { %948 = vmatpush1.bf16.msra.mxu0 %v1742_v20  ;;  %v1772_v20 = vld [vmem:[%s2016_s19] ss:$16 sps:$4 sm:$0xff]  }
  0x3d   : > { %1632 = vmatpush3.bf16.msra.mxu1 %v1729_v13  ;;  %949 = vmatprep.subr.bf16.mxu0 %v1750_v21  ;;  %v1763_v13 = vld [vmem:[%s2016_s19 + $0x48] ss:$16 sps:$4 sm:$0xff]   ;;  %p1808_p0 = pnand %p1807_p12, %p1981_p9 }
  0x3e   : > { %1056 = vmatprep.subr.bf16.mxu1 %v1735_v16  ;;  %v1766_v16 = vld [vmem:[%s2016_s19 + $0x20] ss:$16 sps:$4 sm:$0xff]   ;;  %v1775_v21 = vld [vmem:[%s2016_s19 + $0x8] ss:$16 sps:$4 sm:$0xff]  }
  0x3f   : > { %p1809_p2 = pneg %p1808_p0 }
  0x40   : > { %950 = vmatpush1.bf16.msra.mxu0 %v1748_v22  ;;  %v1892_v22 = vmov 0  }
  0x41   : > { %951 = vmatprep.subr.bf16.mxu0 %v1756_v23 }
  0x42   : > { %1618 = vmatmul.mubr.msk.bf16.gmra.mxu0 %vm416_vm1, %v1723_v8 }
  0x43   : > { %1621 = vmatprep.mubr.msk.bf16.mxu0 %vm416_vm1, %v1724_v9 }
  0x44   : > { %952 = vmatpush1.bf16.msra.mxu0 %v1754_v24 }
  0x4a   : > { %1622 = vmatmul.mubr.msk.bf16.gmra.mxu0 %vm416_vm1, %v1725_v10  ;;  %v1762_v10 = vld [vmem:[%s2016_s19 + $0x44] ss:$16 sps:$4 sm:$0xff]   ;;  %s1517_s19 = sshll.u32 %s1878_s24, 2 }
  0x4b   : > { %953 = vmatprep.subr.bf16.mxu0 %v1762_v10  ;;  %975 = vmatprep.mubr.bf16.mxu0 %v1892_v22  ;;  %p2149_p8 = scmp.lt.s32.totalorder %s1517_s19, 7 }
  0x4c   : > { %954 = vmatpush1.bf16.msra.mxu0 %v1760_v12 }
  0x4d   : > { %955 = vmatprep.subr.bf16.mxu0 %v1768_v14  ;;  %s2226_s19 = smov (!%p2149_p8, %s1517_s19), 7 }
  0x4e   : > { %s350_s8 = scalar_lea.vmem %s2206_s5, %s2226_s19  ;;  %s1894_s19 = smov [#allocation5]  }
  0x4f   : > { %s1810_s27 = sshll.u32 %s1894_s19, 4  ;;  %s1811_s27 = int_to_ptr.vmem [resolvable:$false] %s1810_s27 }
  0x50   : > { %956 = vmatpush1.bf16.msra.mxu0 %v1766_v16  ;;  %s1812_s24 = scalar_lea.vmem %s1811_s27, 256  ;;  %p1813_p3 = scmp.lt.s32.totalorder %s1393_s13, %s1811_s27 }
  0x51   : > { %957 = vmatprep.subr.bf16.mxu0 %v1774_v18  ;;  %p1814_p5 = scmp.lt.s32.totalorder %s1812_s24, %s1806_s20 }
  0x53   : > { %p1815_p6 = por %p1814_p5, %p1813_p3 }
  0x54   : > { %958 = vmatpush1.bf16.msra.mxu0 %v1772_v20 }
  0x55   : > { %p1816_p7 = pnand %p1815_p6, %p1809_p2 }
  0xf2   : > { %v1611_v25 = vpop.f32.mrf.mxu0 }
  0xf3   : > { %v544_v32 = vmax.f32 %v1611_v25, 0.0  ;;  %v2114_v25 = vld [vmem:[%s2204_s3] ss:$0 sm:$0xff] }
  0xf4   : > { %v479_v26 = vpop.f32.mrf.mxu0 }
  0xf5   : > { %v542_v30 = vmax.f32 %v479_v26, 0.0 }
  0xf6   : > { %v1612_v27 = vpop.f32.mrf.mxu0 }
  0xf7   : > { %v545_v28 = vmax.f32 %v1612_v27, 0.0 }
  0xf8   : > { %v482_v29 = vpop.f32.mrf.mxu0 }
  0xf9   : > { %v543_v31 = vmax.f32 %v482_v29, 0.0  ;;  %v559_v36 = vpack.c.bf16 %v545_v28, %v544_v32 }
  0xfa   : > { %v1615_v33 = vpop.f32.mrf.mxu0 }
  0xfb   : > { %v558_v34 = vpack.c.bf16 %v543_v31, %v542_v30  ;;  %v548_v39 = vmax.f32 %v1615_v33, 0.0 }
  0xfc   : > { %v495_v37 = vpop.f32.mrf.mxu0 }
  0xfd   : > { %1633 = vmatprep.mubr.msk.bf16.mxu1 %vm605_vm2, %v558_v34  ;;  %v546_v41 = vmax.f32 %v495_v37, 0.0 }
  0xfe   : > { %v1616_v40 = vpop.f32.mrf.mxu0  ;;  %1634 = vmatmul.mubr.msk.bf16.vlgmr.msra.gmra.mxu1 %vm605_vm2, %v559_v36 }
  0xff   : > { %v549_v42 = vmax.f32 %v1616_v40, 0.0  ;;  %1057 = vmatpush1.bf16.msra.mxu1 %v1733_v35 }
 0x100   : > { %v498_v44 = vpop.f32.mrf.mxu0  ;;  %1058 = vmatprep.subr.bf16.mxu1 %v1741_v38 }
 0x101   : > { %v547_v46 = vmax.f32 %v498_v44, 0.0  ;;  %v561_v47 = vpack.c.bf16 %v549_v42, %v548_v39 }
 0x102   : > { %v1619_v48 = vpop.f32.mrf.mxu0 }
 0x103   : > { %v560_v49 = vpack.c.bf16 %v547_v46, %v546_v41  ;;  %1059 = vmatpush1.bf16.msra.mxu1 %v1739_v43  ;;  %v552_v53 = vmax.f32 %v1619_v48, 0.0 }
 0x104   : > { %v511_v51 = vpop.f32.mrf.mxu0  ;;  %1060 = vmatprep.subr.bf16.mxu1 %v1747_v45 }
 0x105   : > { %1637 = vmatprep.mubr.msk.bf16.mxu1 %vm605_vm2, %v560_v49  ;;  %v550_v55 = vmax.f32 %v511_v51, 0.0 }
 0x106   : > { %1638 = vmatmul.mubr.msk.bf16.gmra.mxu1 %vm605_vm2, %v561_v47  ;;  %v1620_v54 = vpop.f32.mrf.mxu0 }
 0x107   : > { %v553_v56 = vmax.f32 %v1620_v54, 0.0  ;;  %1061 = vmatpush1.bf16.msra.mxu1 %v1745_v50 }
 0x108   : > { %v514_v58 = vpop.f32.mrf.mxu0  ;;  %1062 = vmatprep.subr.bf16.mxu1 %v1753_v52 }
 0x109   : > { %v551_v60 = vmax.f32 %v514_v58, 0.0  ;;  %v563_v61 = vpack.c.bf16 %v553_v56, %v552_v53 }
 0x10a   : > { %v1623_v62 = vpop.f32.mrf.mxu0 }
 0x10b   : > { %v562_v63 = vpack.c.bf16 %v551_v60, %v550_v55  ;;  %1063 = vmatpush1.bf16.msra.mxu1 %v1751_v57  ;;  %v556_v2 = vmax.f32 %v1623_v62, 0.0 }
 0x10c   : > { %v527_v1 = vpop.f32.mrf.mxu0  ;;  %1064 = vmatprep.subr.bf16.mxu1 %v1759_v59 }
 0x10d   : > { %1641 = vmatprep.mubr.msk.bf16.mxu1 %vm605_vm2, %v562_v63  ;;  %v554_v4 = vmax.f32 %v527_v1, 0.0 }
 0x10e   : > { %1642 = vmatmul.mubr.msk.bf16.gmra.mxu1 %vm605_vm2, %v563_v61  ;;  %v1624_v3 = vpop.f32.mrf.mxu0 }
 0x10f   : > { %v557_v5 = vmax.f32 %v1624_v3, 0.0  ;;  %1065 = vmatpush1.bf16.msra.mxu1 %v1757_v0 }
 0x110   : > { %v530_v6 = vpop.f32.mrf.mxu0  ;;  %1066 = vmatprep.subr.bf16.mxu1 %v1765_v11 }
 0x111   : > { %v555_v7 = vmax.f32 %v530_v6, 0.0  ;;  %v565_v8 = vpack.c.bf16 %v557_v5, %v556_v2 }
 0x113   : > { %v564_v9 = vpack.c.bf16 %v555_v7, %v554_v4  ;;  %1067 = vmatpush1.bf16.msra.mxu1 %v1763_v13 }
 0x114   : > { %1068 = vmatprep.subr.bf16.mxu1 %v1771_v15 }
 0x115   : > { %1645 = vmatprep.mubr.msk.bf16.mxu1 %vm605_vm2, %v564_v9 }
 0x116   : > { %1646 = vmatmul.mubr.msk.bf16.gmra.mxu1 %vm605_vm2, %v565_v8 }
 0x117   : > { %1069 = vmatpush1.bf16.msra.mxu1 %v1769_v17  ;;  %1088 = vmatprep.mubr.bf16.mxu1 %v1892_v22 }
 0x118   : > { %1070 = vmatprep.subr.bf16.mxu1 %v1777_v19 }
 0x11b   : > { %1071 = vmatpush1.bf16.msra.mxu1 %v1775_v21 }
 0x1be   : > { %v1635_v23 = vpop.f32.mrf.mxu1 }
 0x1bf   : > { %v673_v37 = vadd.f32 %v1635_v23, %v2114_v25 }
 0x1c0   : > { %v664_v24 = vpop.f32.mrf.mxu1 }
 0x1c1   : > { %v665_v27 = vadd.f32 %v2114_v25, %v664_v24  ;;  %v729_v40 = vmax.f32 %v673_v37, 0.0 }
 0x1c2   : > { %v1636_v26 = vpop.f32.mrf.mxu1 }
 0x1c3   : > { %v727_v31 = vmax.f32 %v665_v27, 0.0  ;;  %v676_v34 = vadd.f32 %v1636_v26, %v2114_v25 }
 0x1c4   : > { %v667_v28 = vpop.f32.mrf.mxu1 }
 0x1c5   : > { %v668_v29 = vadd.f32 %v2114_v25, %v667_v28  ;;  %v730_v38 = vmax.f32 %v676_v34, 0.0 }
 0x1c6   : > { %v1639_v30 = vpop.f32.mrf.mxu1 }
 0x1c7   : > { %v728_v32 = vmax.f32 %v668_v29, 0.0  ;;  %v744_v41 = vpack.c.bf16 %v730_v38, %v729_v40  ;;  %v689_v51 = vadd.f32 %v1639_v30, %v2114_v25 }
 0x1c8   : > { %v680_v33 = vpop.f32.mrf.mxu1 }
 0x1c9   : > { %v743_v35 = vpack.c.bf16 %v728_v32, %v727_v31  ;;  %v681_v44 = vadd.f32 %v2114_v25, %v680_v33  ;;  %v733_v54 = vmax.f32 %v689_v51, 0.0 }
 0x1ca   : > { %v1640_v36 = vpop.f32.mrf.mxu1 }
 0x1cb   : > { %976 = vmatmul.mubr.bf16.vlgmr.msra.gmra.mxu0 %v743_v35  ;;  %1089 = vmatmul.mubr.bf16.vlgmr.msra.gmra.mxu1 %v743_v35  ;;  %v731_v47 = vmax.f32 %v681_v44, 0.0  ;;  %v692_v48 = vadd.f32 %v1640_v36, %v2114_v25 }
 0x1cc   : > { %985 = vmatprep.mubr.bf16.mxu0 %v1892_v22  ;;  %1098 = vmatprep.mubr.bf16.mxu1 %v1892_v22  ;;  %v683_v39 = vpop.f32.mrf.mxu1 }
 0x1cd   : > { %v684_v42 = vadd.f32 %v2114_v25, %v683_v39  ;;  %v734_v52 = vmax.f32 %v692_v48, 0.0 }
 0x1ce   : > { %v1643_v43 = vpop.f32.mrf.mxu1 }
 0x1cf   : > { %v732_v45 = vmax.f32 %v684_v42, 0.0  ;;  %v746_v55 = vpack.c.bf16 %v734_v52, %v733_v54  ;;  %v705_v62 = vadd.f32 %v1643_v43, %v2114_v25 }
 0x1d0   : > { %v696_v46 = vpop.f32.mrf.mxu1 }
 0x1d1   : > { %v745_v49 = vpack.c.bf16 %v732_v45, %v731_v47  ;;  %v697_v56 = vadd.f32 %v2114_v25, %v696_v46  ;;  %v737_v2 = vmax.f32 %v705_v62, 0.0 }
 0x1d2   : > { %v1644_v50 = vpop.f32.mrf.mxu1 }
 0x1d3   : > { %986 = vmatmul.mubr.bf16.gmra.mxu0 %v744_v41  ;;  %1099 = vmatmul.mubr.bf16.gmra.mxu1 %v744_v41  ;;  %v735_v59 = vmax.f32 %v697_v56, 0.0  ;;  %v708_v63 = vadd.f32 %v1644_v50, %v2114_v25 }
 0x1d4   : > { %995 = vmatprep.mubr.bf16.mxu0 %v1892_v22  ;;  %1108 = vmatprep.mubr.bf16.mxu1 %v1892_v22  ;;  %v699_v53 = vpop.f32.mrf.mxu1 }
 0x1d5   : > { %v700_v57 = vadd.f32 %v2114_v25, %v699_v53  ;;  %v738_v3 = vmax.f32 %v708_v63, 0.0 }
 0x1d6   : > { %v1647_v58 = vpop.f32.mrf.mxu1 }
 0x1d7   : > { %v736_v60 = vmax.f32 %v700_v57, 0.0  ;;  %v748_v5 = vpack.c.bf16 %v738_v3, %v737_v2  ;;  %v721_v10 = vadd.f32 %v1647_v58, %v2114_v25 }
 0x1d8   : > { %v712_v61 = vpop.f32.mrf.mxu1 }
 0x1d9   : > { %v747_v0 = vpack.c.bf16 %v736_v60, %v735_v59  ;;  %v713_v6 = vadd.f32 %v2114_v25, %v712_v61  ;;  %v741_v13 = vmax.f32 %v721_v10, 0.0 }
 0x1da   : > { %v1648_v1 = vpop.f32.mrf.mxu1 }
 0x1db   : > { %996 = vmatmul.mubr.bf16.gmra.mxu0 %v745_v49  ;;  %1109 = vmatmul.mubr.bf16.gmra.mxu1 %v745_v49  ;;  %v739_v8 = vmax.f32 %v713_v6, 0.0  ;;  %v724_v11 = vadd.f32 %v1648_v1, %v2114_v25 }
 0x1dc   : > { %1005 = vmatprep.mubr.bf16.mxu0 %v1892_v22  ;;  %1118 = vmatprep.mubr.bf16.mxu1 %v1892_v22  ;;  %v715_v4 = vpop.f32.mrf.mxu1 }
 0x1dd   : > { %v716_v7 = vadd.f32 %v2114_v25, %v715_v4  ;;  %v742_v14 = vmax.f32 %v724_v11, 0.0 }
 0x1df   : > { %v740_v9 = vmax.f32 %v716_v7, 0.0  ;;  %v750_v15 = vpack.c.bf16 %v742_v14, %v741_v13 }
 0x1e1   : > { %v749_v12 = vpack.c.bf16 %v740_v9, %v739_v8 }
 0x1e3   : > { %1006 = vmatmul.mubr.bf16.gmra.mxu0 %v746_v55  ;;  %1119 = vmatmul.mubr.bf16.gmra.mxu1 %v746_v55 }
 0x1e4   : > { %1015 = vmatprep.mubr.bf16.mxu0 %v1892_v22  ;;  %1128 = vmatprep.mubr.bf16.mxu1 %v1892_v22 }
 0x1eb   : > { %1016 = vmatmul.mubr.bf16.gmra.mxu0 %v747_v0  ;;  %1129 = vmatmul.mubr.bf16.gmra.mxu1 %v747_v0 }
 0x1ec   : > { %1025 = vmatprep.mubr.bf16.mxu0 %v1892_v22  ;;  %1138 = vmatprep.mubr.bf16.mxu1 %v1892_v22 }
 0x1f3   : > { %1026 = vmatmul.mubr.bf16.gmra.mxu0 %v748_v5  ;;  %1139 = vmatmul.mubr.bf16.gmra.mxu1 %v748_v5 }
 0x1f4   : > { %1035 = vmatprep.mubr.bf16.mxu0 %v1892_v22  ;;  %1148 = vmatprep.mubr.bf16.mxu1 %v1892_v22 }
 0x1fb   : > { %1036 = vmatmul.mubr.bf16.gmra.mxu0 %v749_v12  ;;  %1149 = vmatmul.mubr.bf16.gmra.mxu1 %v749_v12 }
 0x1fc   : > { %1045 = vmatprep.mubr.bf16.mxu0 %v1892_v22  ;;  %1158 = vmatprep.mubr.bf16.mxu1 %v1892_v22 }
 0x203   : > { %1046 = vmatmul.mubr.bf16.gmra.mxu0 %v750_v15  ;;  %1159 = vmatmul.mubr.bf16.gmra.mxu1 %v750_v15 }
 0x28b   : > { %v977_v16 = vpop.f32.mrf.mxu0  ;;  %v1090_v17 = vpop.f32.mrf.mxu1 }
 0x28d   : > { %v979_v18 = vpop.f32.mrf.mxu0  ;;  %v1092_v19 = vpop.f32.mrf.mxu1 }
 0x28f   : > { %v981_v20 = vpop.f32.mrf.mxu0  ;;  %v1094_v21 = vpop.f32.mrf.mxu1 }
 0x290   : > { %v1169_v54 = vmax.f32 %v977_v16, %v981_v20  ;;  %v1195_v55 = vmax.f32 %v1090_v17, %v1094_v21 }
 0x291   : > { %v983_v23 = vpop.f32.mrf.mxu0  ;;  %v1096_v24 = vpop.f32.mrf.mxu1 }
 0x292   : > { %v1182_v50 = vmax.f32 %v979_v18, %v983_v23  ;;  %v1208_v51 = vmax.f32 %v1092_v19, %v1096_v24 }
 0x293   : > { %v987_v25 = vpop.f32.mrf.mxu0  ;;  %v1100_v26 = vpop.f32.mrf.mxu1 }
 0x294   : > { %v1170_v60 = vmax.f32 %v1169_v54, %v987_v25  ;;  %v1196_v61 = vmax.f32 %v1195_v55, %v1100_v26 }
 0x295   : > { %v989_v27 = vpop.f32.mrf.mxu0  ;;  %v1102_v28 = vpop.f32.mrf.mxu1 }
 0x296   : > { %v1183_v56 = vmax.f32 %v1182_v50, %v989_v27  ;;  %v1209_v57 = vmax.f32 %v1208_v51, %v1102_v28 }
 0x297   : > { %v991_v29 = vpop.f32.mrf.mxu0  ;;  %v1104_v30 = vpop.f32.mrf.mxu1 }
 0x298   : > { %v1171_v2 = vmax.f32 %v1170_v60, %v991_v29  ;;  %v1197_v3 = vmax.f32 %v1196_v61, %v1104_v30 }
 0x299   : > { %v993_v22 = vpop.f32.mrf.mxu0  ;;  %v1106_v31 = vpop.f32.mrf.mxu1 }
 0x29a   : > { %v1184_v62 = vmax.f32 %v1183_v56, %v993_v22  ;;  %v1210_v63 = vmax.f32 %v1209_v57, %v1106_v31 }
 0x29b   : > { %v997_v32 = vpop.f32.mrf.mxu0  ;;  %v1110_v33 = vpop.f32.mrf.mxu1 }
 0x29c   : > { %v1172_v8 = vmax.f32 %v1171_v2, %v997_v32  ;;  %v1198_v9 = vmax.f32 %v1197_v3, %v1110_v33 }
 0x29d   : > { %v999_v34 = vpop.f32.mrf.mxu0  ;;  %v1112_v35 = vpop.f32.mrf.mxu1 }
 0x29e   : > { %v1185_v4 = vmax.f32 %v1184_v62, %v999_v34  ;;  %v1211_v5 = vmax.f32 %v1210_v63, %v1112_v35 }
 0x29f   : > { %v1001_v36 = vpop.f32.mrf.mxu0  ;;  %v1114_v37 = vpop.f32.mrf.mxu1 }
 0x2a0   : > { %v1173_v14 = vmax.f32 %v1172_v8, %v1001_v36  ;;  %v1199_v15 = vmax.f32 %v1198_v9, %v1114_v37 }
 0x2a1   : > { %v1003_v38 = vpop.f32.mrf.mxu0  ;;  %v1116_v39 = vpop.f32.mrf.mxu1 }
 0x2a2   : > { %v1186_v10 = vmax.f32 %v1185_v4, %v1003_v38  ;;  %v1212_v11 = vmax.f32 %v1211_v5, %v1116_v39 }
 0x2a3   : > { %v1007_v40 = vpop.f32.mrf.mxu0  ;;  %v1120_v41 = vpop.f32.mrf.mxu1 }
 0x2a4   : > { %v1174_v20 = vmax.f32 %v1173_v14, %v1007_v40  ;;  %v1200_v21 = vmax.f32 %v1199_v15, %v1120_v41 }
 0x2a5   : > { %v1009_v42 = vpop.f32.mrf.mxu0  ;;  %v1122_v43 = vpop.f32.mrf.mxu1 }
 0x2a6   : > { %v1187_v16 = vmax.f32 %v1186_v10, %v1009_v42  ;;  %v1213_v17 = vmax.f32 %v1212_v11, %v1122_v43 }
 0x2a7   : > { %v1011_v44 = vpop.f32.mrf.mxu0  ;;  %v1124_v45 = vpop.f32.mrf.mxu1 }
 0x2a8   : > { %v1175_v27 = vmax.f32 %v1174_v20, %v1011_v44  ;;  %v1201_v28 = vmax.f32 %v1200_v21, %v1124_v45 }
 0x2a9   : > { %v1013_v46 = vpop.f32.mrf.mxu0  ;;  %v1126_v47 = vpop.f32.mrf.mxu1 }
 0x2aa   : > { %v1188_v23 = vmax.f32 %v1187_v16, %v1013_v46  ;;  %v1214_v24 = vmax.f32 %v1213_v17, %v1126_v47  ;;  %v1176_v40 = vrot.slane %v1175_v27, 4  ;;  %v1202_v41 = vrot.slane %v1201_v28, 4 }
 0x2ab   : > { %v1017_v48 = vpop.f32.mrf.mxu0  ;;  %v1130_v49 = vpop.f32.mrf.mxu1  ;;  %v1893_v17 = vmov 1983009808  }
 0x2ac   : > { %v1189_v32 = vrot.slane %v1188_v23, 4  ;;  %v1215_v33 = vrot.slane %v1214_v24, 4  ;;  %v1203_v57 = vmax.f32 %v1201_v28, %v1202_v41 }
 0x2ad   : > { %v1019_v52 = vpop.f32.mrf.mxu0  ;;  %v1132_v53 = vpop.f32.mrf.mxu1 }
 0x2ae   : > { %v1190_v50 = vmax.f32 %v1188_v23, %v1189_v32  ;;  %v1204_v9 = vrot.slane %v1203_v57, 2 }
 0x2af   : > { %v1021_v58 = vpop.f32.mrf.mxu0  ;;  %v1134_v59 = vpop.f32.mrf.mxu1 }
 0x2b0   : > { %v1221_v22 = vmax.f32 %v1017_v48, %v1021_v58  ;;  %v1247_v31 = vmax.f32 %v1130_v49, %v1134_v59  ;;  %v1216_v48 = vmax.f32 %v1214_v24, %v1215_v33 }
 0x2b1   : > { %v1023_v0 = vpop.f32.mrf.mxu0  ;;  %v1136_v1 = vpop.f32.mrf.mxu1 }
 0x2b2   : > { %v1234_v36 = vmax.f32 %v1019_v52, %v1023_v0  ;;  %v1260_v37 = vmax.f32 %v1132_v53, %v1136_v1  ;;  %v1177_v53 = vmax.f32 %v1175_v27, %v1176_v40  ;;  %v1191_v0 = vrot.slane %v1190_v50, 2 }
 0x2b3   : > { %v1027_v6 = vpop.f32.mrf.mxu0  ;;  %v1140_v7 = vpop.f32.mrf.mxu1  ;;  %v1217_v1 = vrot.slane %v1216_v48, 2 }
 0x2b4   : > { %v1222_v38 = vmax.f32 %v1221_v22, %v1027_v6  ;;  %v1248_v39 = vmax.f32 %v1247_v31, %v1140_v7  ;;  %v1178_v8 = vrot.slane %v1177_v53, 2  ;;  %v1192_v16 = vmax.f32 %v1190_v50, %v1191_v0 }
 0x2b5   : > { %v1029_v12 = vpop.f32.mrf.mxu0  ;;  %v1142_v13 = vpop.f32.mrf.mxu1  ;;  %v1218_v20 = vmax.f32 %v1216_v48, %v1217_v1 }
 0x2b6   : > { %v1235_v46 = vmax.f32 %v1234_v36, %v1029_v12  ;;  %v1261_v44 = vmax.f32 %v1260_v37, %v1142_v13  ;;  %v1179_v28 = vmax.f32 %v1177_v53, %v1178_v8  ;;  %v1193_v33 = vrot.slane %v1192_v16, 1 }
 0x2b7   : > { %v1031_v18 = vpop.f32.mrf.mxu0  ;;  %v1144_v19 = vpop.f32.mrf.mxu1  ;;  %v1219_v36 = vrot.slane %v1218_v20, 1 }
 0x2b8   : > { %v1223_v45 = vmax.f32 %v1222_v38, %v1031_v18  ;;  %v1249_v47 = vmax.f32 %v1248_v39, %v1144_v19  ;;  %v1285_v18 = vunpack.c.l.s4 %v1893_v17  ;;  %v1287_v19 = vlaneseq }
 0x2b9   : > { %v1033_v25 = vpop.f32.mrf.mxu0  ;;  %v1146_v26 = vpop.f32.mrf.mxu1  ;;  %v1180_v41 = vrot.slane %v1179_v28, 1  ;;  %v1194_v48 = vmax.f32 %v1192_v16, %v1193_v33 }
 0x2ba   : > { %v1236_v54 = vmax.f32 %v1235_v46, %v1033_v25  ;;  %v1262_v55 = vmax.f32 %v1261_v44, %v1146_v26 }
 0x2bb   : > { %v1037_v29 = vpop.f32.mrf.mxu0  ;;  %v1150_v30 = vpop.f32.mrf.mxu1 }
 0x2bc   : > { %v1224_v56 = vmax.f32 %v1223_v45, %v1037_v29  ;;  %v1250_v52 = vmax.f32 %v1249_v47, %v1150_v30  ;;  %v1205_v29 = vmax.f32 %v1203_v57, %v1204_v9 }
 0x2bd   : > { %v1039_v34 = vpop.f32.mrf.mxu0  ;;  %v1152_v35 = vpop.f32.mrf.mxu1 }
 0x2be   : > { %v1237_v60 = vmax.f32 %v1236_v54, %v1039_v34  ;;  %v1263_v61 = vmax.f32 %v1262_v55, %v1152_v35  ;;  %v1286_v34 = vunpack.c.0.s8 %v1285_v18  ;;  %v1288_v35 = vshrl.u32 %v1287_v19, 7 }
 0x2bf   : > { %v1041_v42 = vpop.f32.mrf.mxu0  ;;  %v1154_v43 = vpop.f32.mrf.mxu1 }
 0x2c0   : > { %v1225_v62 = vmax.f32 %v1224_v56, %v1041_v42  ;;  %v1251_v63 = vmax.f32 %v1250_v52, %v1154_v43  ;;  %v1206_v42 = vrot.slane %v1205_v29, 1  ;;  %v1340_v43 = vsub.s32 0, %v1288_v35 }
 0x2c1   : > { %v1043_v49 = vpop.f32.mrf.mxu0  ;;  %v1156_v51 = vpop.f32.mrf.mxu1  ;;  %v1344_v46 = vsub.s32 1, %v1288_v35  ;;  %v1348_v54 = vsub.s32 2, %v1288_v35  ;;  %v1352_v55 = vsub.s32 3, %v1288_v35 }
 0x2c2   : > { %v1238_v4 = vmax.f32 %v1237_v60, %v1043_v49  ;;  %v1264_v5 = vmax.f32 %v1263_v61, %v1156_v51  ;;  %v1220_v49 = vmax.f32 %v1218_v20, %v1219_v36  ;;  %v1336_v51 = vld [vmem:[%s350_s8] sm:$0xf]  ;;  %v1289_v60 = vsub.s32 %v1286_v34, %v1288_v35 }
 0x2c3   : > { %v1047_v58 = vpop.f32.mrf.mxu0  ;;  %v1160_v59 = vpop.f32.mrf.mxu1  ;;  %v1345_v0 = vrot.slane %v1336_v51, %v1344_v46 }
 0x2c4   : > { %v1226_v6 = vmax.f32 %v1225_v62, %v1047_v58  ;;  %v1252_v7 = vmax.f32 %v1251_v63, %v1160_v59  ;;  %v1181_v58 = vmax.f32 %v1179_v28, %v1180_v41  ;;  %v1207_v59 = vmax.f32 %v1205_v29, %v1206_v42 }
 0x2c5   : > { %v1049_v2 = vpop.f32.mrf.mxu0  ;;  %v1162_v3 = vpop.f32.mrf.mxu1  ;;  %v1341_v63 = vrot.slane %v1336_v51, %v1340_v43 }
 0x2c6   : > { %v1239_v12 = vmax.f32 %v1238_v4, %v1049_v2  ;;  %v1265_v13 = vmax.f32 %v1264_v5, %v1162_v3  ;;  %v1282_v1 = vcombine.low %v1181_v58, %v1194_v48  ;;  %v1283_v2 = vcombine.low %v1207_v59, %v1220_v49 }
 0x2c7   : > { %v1051_v10 = vpop.f32.mrf.mxu0  ;;  %v1164_v11 = vpop.f32.mrf.mxu1  ;;  %v1349_v3 = vrot.slane %v1336_v51, %v1348_v54  ;;  %v1353_v4 = vrot.slane %v1336_v51, %v1352_v55 }
 0x2c8   : > { %v1227_v14 = vmax.f32 %v1226_v6, %v1051_v10  ;;  %v1253_v15 = vmax.f32 %v1252_v7, %v1164_v11  ;;  %v1354_v11 = vcombine.low %v1341_v63, %v1345_v0 }
 0x2c9   : > { %v1053_v21 = vpop.f32.mrf.mxu0  ;;  %v1166_v23 = vpop.f32.mrf.mxu1 }
 0x2ca   : > { %v1228_v24 = vrot.slane %v1227_v14, 4  ;;  %v1254_v25 = vrot.slane %v1253_v15, 4  ;;  %v1240_v26 = vmax.f32 %v1239_v12, %v1053_v21  ;;  %v1266_v27 = vmax.f32 %v1265_v13, %v1166_v23 }
 0x2cb   : > { %v1355_v12 = vcombine.low %v1349_v3, %v1353_v4  ;;  %v1290_v13 = vrot.slane %v1282_v1, %v1289_v60  ;;  %v1362_v20 = vrot.slane %v1354_v11, %v1289_v60 }
 0x2cc   : > { %v1229_v30 = vmax.f32 %v1227_v14, %v1228_v24  ;;  %v1255_v22 = vmax.f32 %v1253_v15, %v1254_v25  ;;  %v1241_v31 = vrot.slane %v1240_v26, 4  ;;  %v1267_v32 = vrot.slane %v1266_v27, 4 }
 0x2cd   : > { %v1297_v14 = vrot.slane %v1283_v2, %v1289_v60  ;;  %v1369_v21 = vrot.slane %v1355_v12, %v1289_v60 }
 0x2ce   : > { %v1230_v37 = vrot.slane %v1229_v30, 2  ;;  %v1256_v38 = vrot.slane %v1255_v22, 2  ;;  %v1242_v39 = vmax.f32 %v1240_v26, %v1241_v31  ;;  %v1268_v40 = vmax.f32 %v1266_v27, %v1267_v32 }
 0x2cf   : > { %v1298_v18 = vcombine.low %v1290_v13, %v1297_v14  ;;  %v1370_v26 = vcombine.low %v1362_v20, %v1369_v21 }
 0x2d0   : > { %v1231_v44 = vmax.f32 %v1229_v30, %v1230_v37  ;;  %v1257_v45 = vmax.f32 %v1255_v22, %v1256_v38  ;;  %v1243_v47 = vrot.slane %v1242_v39, 2  ;;  %v1269_v50 = vrot.slane %v1268_v40, 2 }
 0x2d2   : > { %v1232_v56 = vrot.slane %v1231_v44, 1  ;;  %v1258_v52 = vrot.slane %v1257_v45, 1  ;;  %v1244_v53 = vmax.f32 %v1242_v39, %v1243_v47  ;;  %v1270_v57 = vmax.f32 %v1268_v40, %v1269_v50 }
 0x2d4   : > { %v1245_v61 = vrot.slane %v1244_v53, 1  ;;  %v1271_v62 = vrot.slane %v1270_v57, 1  ;;  %v1233_v5 = vmax.f32 %v1231_v44, %v1232_v56  ;;  %v1259_v6 = vmax.f32 %v1257_v45, %v1258_v52 }
 0x2d6   : > { %v1246_v7 = vmax.f32 %v1244_v53, %v1245_v61  ;;  %v1272_v8 = vmax.f32 %v1270_v57, %v1271_v62 }
 0x2d8   : > { %v1299_v9 = vcombine.low %v1233_v5, %v1246_v7  ;;  %v1300_v10 = vcombine.low %v1259_v6, %v1272_v8 }
 0x2da   : > { %v1307_v15 = vrot.slane %v1299_v9, %v1289_v60  ;;  %v1314_v16 = vrot.slane %v1300_v10, %v1289_v60 }
 0x2dc   : > { %v1315_v17 = vcombine.low %v1307_v15, %v1314_v16 }
 0x2de   : > { %v1320_v19 = vrot.slane %v1315_v17, 7 }
 0x2e0   : > { %v1322_v23 = vsel %vm1321_vm3, %v1320_v19, %v1298_v18 }
 0x2e1   : > { %v1324_v24 = vsel %vm1323_vm4, %v1320_v19, %v1322_v23 }
 0x2e2   : > { %v1326_v25 = vsel %vm1325_vm5, %v1320_v19, %v1324_v24 }
 0x2e3   : > { %v1328_v27 = vsel %vm1327_vm6, %v1320_v19, %v1326_v25 }
 0x2e4   : > { %v1372_v28 = vadd.f32 %v1370_v26, %v1328_v27 }
 0x2e6   : > { %v1373_v29 = vmax.f32 %v1372_v28, 0.0 }
 0x2e8   : > { %1374 = vst [vmem:[%s333_s7] sm:$0xff] %v1373_v29 }
 0x2e9   : > { %1819 = shalt.err (!%p1816_p7)
}
 0x2ea   : > { %s1820_s28 = scalar_lea.hbm %s1390_s17, 128  ;;  %s1824_s8 = scalar_lea.hbm %s2207_s6, 256 }
 0x2eb   : > { %p1821_p10 = scmp.ne.s32.totalorder %s1390_s17, %s1820_s28  ;;  %p1825_p1 = scmp.lt.s32.totalorder %s1390_s17, %s2207_s6 }
 0x2ec   : > { %p1826_p8 = scmp.lt.s32.totalorder %s1824_s8, %s1820_s28 }
 0x2ed   : > { %p1822_p4 = pnand %p1821_p10, %p1981_p9 }
 0x2ee   : > { %p1827_p12 = por %p1826_p8, %p1825_p1 }
 0x2ef   : > { %p1823_p13 = pneg %p1822_p4 }
 0x2f1   : > { %p1828_p0 = pnand %p1827_p12, %p1823_p13 }
 0x2f3   : > { %1831 = shalt.err (!%p1828_p0)
}
 0x2f4   : > { %1652 = dma.vmem_to_hbm [thread:$0]  (%p1981_p9), %s1393_s13, 128, %s1390_s17, %s1376_s18  }
 0x2f5 PF: > { %s1404_s7 = sand.u32 1, %s1866_s21   ;;  %p2216_p2 = scmp.ge.s32.totalorder %s1886_s26, 2 }
 0x2f6   : > { %s1405_s14 = scalar_lea.sflag [#allocation4], %s1404_s7 }
 0x2f7   : > { %p1659_p3 = pnand %p2216_p2, %p1988_p11 }
 0x2f9   : > { %p1660_p5 = pneg %p1659_p3 }
 0x2fb   : > { %1861 = dma.done.wait (%p1660_p5), %s1405_s14, 128  }
 0x2fc   : > { %1863 = vsyncadd (%p1660_p5), %s1405_s14, 4294967168  ;;  %s22_s26 = sadd.s32 1, %s1886_s26   ;;  %s2217_s10 = sld [smem:[#allocation8_spill]] }
 0x2fd   : > { %p19_p6 = scmp.ge.s32.totalorder %s22_s26, 4   ;;  %s2218_s21 = smov %s1870_s22 }
 0x2fe   : > { %s2219_s22 = smov %s1874_s23  ;;  %s2220_s23 = smov %s1986_s11 }
 0x2ff   : > { %s2221_s24 = smov %s1882_s25  ;;  %21 = sbr.rel (!%p19_p6) target bundleno = 6 (0x6), region = 103 }
 0x302   : > { %s2222_s25 = smov %s2217_s10 }
 0x304   :  { %1410 = vsyncpa [#allocation3], 1 }
 0x305   :  { %1412 = vsyncpa [#allocation3 + $0x1], 1 }
 0x306   :  { %1413 = vsyncpa [#allocation4], 1 }
 0x307   :  { %1415 = vsyncpa [#allocation4 + $0x1], 1 }

</bundles_post_ra>
